<compile_context>
chip_gen: v7x
topology: tpu7x:2x2x1
jax: 0.10.0
libtpu: 0.0.40
codegen_flags: <defaults>
</compile_context>

<pallas_src>
import functools
import math

import numpy as np

import jax
import jax.numpy as jnp
from jax.experimental import pallas as pl
from jax.experimental.pallas import tpu as pltpu

_INV_SQRT2 = 1.0 / math.sqrt(2.0)

# Resident-operand bytes above which single-buffering (Buffered(1)) is worth requesting.
_SINGLE_BUFFER_BYTES = 4 << 20

_FALLBACK_ERRORS = tuple(
    e for e in (
        getattr(pltpu, "LoweringException", None),
        getattr(jax.errors, "JaxRuntimeError", None),
        NotImplementedError,
        TypeError,
        ValueError,
    )
    if isinstance(e, type) and issubclass(e, BaseException)
)


def _round_up(a, b):
    return (a + b - 1) // b * b


def _tpu_vmem_capacity():
    """Per-core VMEM capacity in bytes (falls back to 128 MiB if unavailable)."""
    try:
        return int(pltpu.get_tpu_info().vmem_capacity_bytes)
    except Exception:
        return 128 << 20


def _mlp_kernel(x_ref, w1_ref, w2_ref, vec_ref, o_ref, *, approx_gelu):
    # Cast activations to bf16 in VMEM (no extra wrapper-side HBM pass over x);
    # both matmuls run with bf16 operands on the MXU and f32 accumulation.
    x = x_ref[...].astype(jnp.bfloat16)

    v = vec_ref[...]                              # (4, hid) f32: b1, b2, gamma, beta
    b1, b2, gamma, beta = v[0:1], v[1:2], v[2:3], v[3:4]

    # fc1
    h = jnp.dot(x, w1_ref[...], preferred_element_type=jnp.float32) + b1

    if approx_gelu:
        # tanh-approx GELU: transcendental runs on the otherwise-idle EUP slot.
        h = jax.nn.gelu(h, approximate=True)
    else:
        # Exact erf GELU, matching PyTorch F.gelu default numerics.
        h = 0.5 * h * (1.0 + jax.lax.erf(h * _INV_SQRT2))

    # LayerNorm over the last dim, eps=1e-6; single pass (reuse the centered term).
    mean = jnp.mean(h, axis=-1, keepdims=True)
    c = h - mean
    var = jnp.mean(c * c, axis=-1, keepdims=True)
    h = c * jax.lax.rsqrt(var + 1e-6) * gamma + beta

    # dropout: inference mode -> identity.
    # TODO(synk): training-mode dropout would need pltpu.prng_seed + prng_random_bits.

    # fc2
    out = jnp.dot(h.astype(w2_ref.dtype), w2_ref[...],
                  preferred_element_type=jnp.float32) + b2

    # self.norm is None in the train_arxiv.py instantiation -> skipped.
    o_ref[...] = out.astype(o_ref.dtype)


def _resident_spec(shape, single_buffer):
    """BlockSpec for an operand that is identical for every grid step."""
    index_map = lambda i: (0,) * len(shape)
    if single_buffer:
        # Grid-invariant block: one VMEM copy is enough (frees VMEM on 64 MiB parts).
        return pl.BlockSpec(shape, index_map, pipeline_mode=pl.Buffered(1))
    return pl.BlockSpec(shape, index_map)


@functools.partial(
    jax.jit,
    static_argnames=("tm", "n_pad", "single_buffer", "approx_gelu", "out_dtype"),
)
def _forward_impl(x, w1_bf, w2_bf, vecs, *, tm, n_pad, single_buffer,
                  approx_gelu, out_dtype):
    n, d_in = x.shape
    hid = w1_bf.shape[1]

    # Row padding (only when needed) is a single fused op under this jit; the bf16
    # cast of x happens inside the kernel, so x is read from HBM exactly once.
    if n_pad != n:
        x = jnp.pad(x, ((0, n_pad - n), (0, 0)))

    grid = (n_pad // tm,)
    xb = np.dtype(x.dtype).itemsize
    ob = np.dtype(out_dtype).itemsize
    wbuf = 1 if single_buffer else 2
    resident = d_in * hid * 2 + hid * hid * 2 + 4 * hid * 4

    est = (2 * tm * d_in * xb            # x tiles (double buffered)
           + 2 * tm * hid * ob           # out tiles (double buffered)
           + wbuf * resident             # resident weights / packed vectors
           + 6 * tm * hid * 4)           # f32 intermediates headroom
    vmem_cap = int(_tpu_vmem_capacity() * 0.8)     # leave compiler headroom (esp. v7x)
    vmem_limit = int(min(vmem_cap, max(16 << 20, 2 * est)))

    cost = pl.CostEstimate(
        flops=2 * n_pad * (d_in * hid + hid * hid),
        transcendentals=n_pad * hid,               # GELU
        bytes_accessed=n_pad * d_in * xb + resident + n_pad * hid * ob,
    )

    out = pl.pallas_call(
        functools.partial(_mlp_kernel, approx_gelu=approx_gelu),
        out_shape=jax.ShapeDtypeStruct((n_pad, hid), out_dtype),
        grid_spec=pltpu.PrefetchScalarGridSpec(
            num_scalar_prefetch=0,
            grid=grid,
            in_specs=[
                pl.BlockSpec((tm, d_in), lambda i: (i, 0)),   # x tile (orig dtype)
                _resident_spec((d_in, hid), single_buffer),   # W1 (bf16)
                _resident_spec((hid, hid), single_buffer),    # W2 (bf16)
                _resident_spec((4, hid), single_buffer),      # b1,b2,gamma,beta (f32)
            ],
            out_specs=pl.BlockSpec((tm, hid), lambda i: (i, 0)),
        ),
        compiler_params=pltpu.CompilerParams(
            dimension_semantics=("parallel",),
            vmem_limit_bytes=vmem_limit,
        ),
        cost_estimate=cost,
    )(x, w1_bf, w2_bf, vecs)

    return out[:n] if n_pad != n else out


def prepare_mlp_params(w1, b1, w2, b2, gamma, beta):
    """One-time parameter prep: bf16 weight casts + packed (4, hid) f32 vector operand.

    Weights are (in_features, out_features) (transposed vs. PyTorch's (out, in)).
    Call once after parameter creation / update, not per forward call.
    """
    hid = w1.shape[1]
    w1_bf = jnp.asarray(w1, jnp.bfloat16)
    w2_bf = jnp.asarray(w2, jnp.bfloat16)
    vecs = jnp.stack([
        jnp.asarray(b1, jnp.float32).reshape(hid),
        jnp.asarray(b2, jnp.float32).reshape(hid),
        jnp.asarray(gamma, jnp.float32).reshape(hid),
        jnp.asarray(beta, jnp.float32).reshape(hid),
    ], axis=0)
    return w1_bf, w2_bf, vecs


def mlp_forward(x, params, *, tm=None, approx_gelu=False, out_dtype=jnp.float32):
    """Fused MLP forward. `params` comes from prepare_mlp_params (one-time prep)."""
    w1_bf, w2_bf, vecs = params
    n, d_in = x.shape
    hid = w1_bf.shape[1]

    vmem_cap = _tpu_vmem_capacity()
    small_vmem = vmem_cap <= (80 << 20)        # v7x-class part: 64 MiB / TC, 2 TCs/chip

    if tm is None:
        tm = 512 if small_vmem else 1024       # bigger tiles amortize per-step overhead
    tm = max(16, _round_up(int(tm), 16))       # 16-row multiples: full bf16 vregs

    n16 = _round_up(n, 16)
    tm_eff = min(tm, n16)
    if small_vmem and n16 >= 32:
        # v7x has 2 TensorCores: keep >= 2 parallel grid steps so both stay busy.
        tm_eff = min(tm_eff, _round_up((n16 + 1) // 2, 16))
    n_pad = _round_up(n16, tm_eff)

    resident = d_in * hid * 2 + hid * hid * 2 + 4 * hid * 4
    want_single = resident > _SINGLE_BUFFER_BYTES
    # TODO(synk): for hidden sizes where even a single-buffered W2 blows 64 MiB VMEM
    # on v7x, add a K/hid grid axis marked "arbitrary" with an f32 accumulator scratch.

    attempts = [True, False] if want_single else [False]
    last_err = None
    for single_buffer in attempts:
        try:
            return _forward_impl(
                x, w1_bf, w2_bf, vecs,
                tm=tm_eff, n_pad=n_pad, single_buffer=single_buffer,
                approx_gelu=bool(approx_gelu), out_dtype=np.dtype(out_dtype),
            )
        except _FALLBACK_ERRORS as e:   # narrow fallback: drop Buffered(1) request only
            last_err = e
    raise last_err


def _mlp_reference(x, w1, b1, w2, b2, gamma, beta):
    """Pure-JAX reference using the same bf16-operand / f32-accumulate matmuls."""
    h = jnp.dot(x.astype(jnp.bfloat16), w1.astype(jnp.bfloat16),
                preferred_element_type=jnp.float32) + b1.reshape(1, -1)
    h = 0.5 * h * (1.0 + jax.lax.erf(h * _INV_SQRT2))
    mean = jnp.mean(h, axis=-1, keepdims=True)
    c = h - mean
    var = jnp.mean(c * c, axis=-1, keepdims=True)
    h = c * jax.lax.rsqrt(var + 1e-6) * gamma.reshape(1, -1) + beta.reshape(1, -1)
    return jnp.dot(h.astype(jnp.bfloat16), w2.astype(jnp.bfloat16),
                   preferred_element_type=jnp.float32) + b2.reshape(1, -1)


def _xavier_uniform(key, fan_in, fan_out):
    # matches nn.init.xavier_uniform_ on a (out, in) weight; stored transposed.
    limit = math.sqrt(6.0 / (fan_in + fan_out))
    return jax.random.uniform(
        key, (fan_in, fan_out), minval=-limit, maxval=limit, dtype=jnp.float32
    )


if __name__ == "__main__":
    # Node-feature matrix (N, input_dim); N deliberately not a tile multiple to
    # exercise the ragged-row path.
    N, INPUT_DIM, HID_DIM = 100, 64, 128

    key = jax.random.PRNGKey(0)
    kx, kw1, kb1, kw2, kb2 = jax.random.split(key, 5)

    x = jax.random.normal(kx, (N, INPUT_DIM), dtype=jnp.float32)

    # Deterministic parameter init mirroring MLP._init_weights()
    w1 = _xavier_uniform(kw1, INPUT_DIM, HID_DIM)                     # fc1.weight^T
    b1 = (1e-6 * jax.random.normal(kb1, (HID_DIM,))).astype(jnp.float32)
    w2 = _xavier_uniform(kw2, HID_DIM, HID_DIM)                       # fc2.weight^T
    b2 = (1e-6 * jax.random.normal(kb2, (HID_DIM,))).astype(jnp.float32)
    gamma = jnp.ones((HID_DIM,), dtype=jnp.float32)                   # layernorm weight
    beta = jnp.zeros((HID_DIM,), dtype=jnp.float32)                   # layernorm bias

    # One-time parameter prep (bf16 casts + packed bias/LN vectors).
    params = prepare_mlp_params(w1, b1, w2, b2, gamma, beta)

    out = mlp_forward(x, params)
    jax.block_until_ready(out)

    assert out.shape == (N, HID_DIM)
    assert bool(jnp.isfinite(out).all())

    ref = _mlp_reference(x, w1, b1, w2, b2, gamma, beta)
    max_err = float(jnp.max(jnp.abs(out - ref)))
    assert max_err < 1e-2, f"max abs err vs reference: {max_err}"

    print("KERNEL_OK")
</pallas_src>

<mosaic_0001>
module attributes {stable_mosaic.version = 11 : i64} {
  func.func @_mlp_kernel(%arg0: i32, %arg1: memref<112x64xf32, #tpu.memory_space<vmem>>, %arg2: memref<64x128xbf16, #tpu.memory_space<vmem>>, %arg3: memref<128x128xbf16, #tpu.memory_space<vmem>>, %arg4: memref<4x128xf32, #tpu.memory_space<vmem>>, %arg5: memref<112x128xf32, #tpu.memory_space<vmem>>) attributes {dimension_semantics = [#tpu.dimension_semantics<parallel>], iteration_bounds = array<i64: 1>, scalar_prefetch = 0 : i64, scratch_operands = 0 : i64, tpu.core_type = #tpu.core_type<tc>, window_params = [{transform_indices = @transform_0, window_bounds = array<i64: 112, 64>}, {pipeline_mode = #tpu.pipeline_mode<synchronous>, transform_indices = @transform_1, window_bounds = array<i64: 64, 128>}, {pipeline_mode = #tpu.pipeline_mode<synchronous>, transform_indices = @transform_2, window_bounds = array<i64: 128, 128>}, {pipeline_mode = #tpu.pipeline_mode<synchronous>, transform_indices = @transform_3, window_bounds = array<i64: 4, 128>}, {transform_indices = @transform_4, window_bounds = array<i64: 112, 128>}]} {
    %c0 = arith.constant 0 : index
    %c0_0 = arith.constant 0 : index
    %0 = vector.load %arg1[%c0, %c0_0] : memref<112x64xf32, #tpu.memory_space<vmem>>, vector<112x64xf32>
    %1 = arith.truncf %0 : vector<112x64xf32> to vector<112x64xbf16>
    %c0_1 = arith.constant 0 : index
    %c0_2 = arith.constant 0 : index
    %2 = vector.load %arg4[%c0_1, %c0_2] : memref<4x128xf32, #tpu.memory_space<vmem>>, vector<4x128xf32>
    %3 = vector.extract_strided_slice %2 {offsets = [0, 0], sizes = [1, 128], strides = [1, 1]} : vector<4x128xf32> to vector<1x128xf32>
    %4 = vector.extract_strided_slice %2 {offsets = [1, 0], sizes = [1, 128], strides = [1, 1]} : vector<4x128xf32> to vector<1x128xf32>
    %5 = vector.extract_strided_slice %2 {offsets = [2, 0], sizes = [1, 128], strides = [1, 1]} : vector<4x128xf32> to vector<1x128xf32>
    %6 = vector.extract_strided_slice %2 {offsets = [3, 0], sizes = [1, 128], strides = [1, 1]} : vector<4x128xf32> to vector<1x128xf32>
    %c0_3 = arith.constant 0 : index
    %c0_4 = arith.constant 0 : index
    %7 = vector.load %arg2[%c0_3, %c0_4] : memref<64x128xbf16, #tpu.memory_space<vmem>>, vector<64x128xbf16>
    %cst = arith.constant dense<0.000000e+00> : vector<112x128xf32>
    %8 = tpu.matmul %1, %7, %cst {dimension_numbers = #tpu.dot_dimension_numbers<[1], [0], [0], [1], [0, 0, 1, 1], [], []>} : vector<112x64xbf16>, vector<64x128xbf16>, vector<112x128xf32> -> vector<112x128xf32>
    %9 = vector.broadcast %3 : vector<1x128xf32> to vector<112x128xf32>
    %10 = arith.addf %8, %9 : vector<112x128xf32>
    %cst_5 = arith.constant 5.000000e-01 : f32
    %11 = vector.broadcast %cst_5 : f32 to vector<112x128xf32>
    %12 = arith.mulf %11, %10 : vector<112x128xf32>
    %cst_6 = arith.constant 0.707106769 : f32
    %13 = vector.broadcast %cst_6 : f32 to vector<112x128xf32>
    %14 = arith.mulf %10, %13 : vector<112x128xf32>
    %15 = math.erf %14 : vector<112x128xf32>
    %cst_7 = arith.constant 1.000000e+00 : f32
    %16 = vector.broadcast %cst_7 : f32 to vector<112x128xf32>
    %17 = arith.addf %16, %15 : vector<112x128xf32>
    %18 = arith.mulf %12, %17 : vector<112x128xf32>
    %cst_8 = arith.constant dense<0.000000e+00> : vector<112xf32>
    %19 = vector.multi_reduction <add>, %18, %cst_8 [1] : vector<112x128xf32> to vector<112xf32>
    %20 = vector.shape_cast %19 : vector<112xf32> to vector<112x1xf32>
    %cst_9 = arith.constant 1.280000e+02 : f32
    %21 = vector.broadcast %cst_9 : f32 to vector<112x1xf32>
    %22 = arith.divf %20, %21 : vector<112x1xf32>
    %23 = vector.broadcast %22 : vector<112x1xf32> to vector<112x128xf32>
    %24 = arith.subf %18, %23 : vector<112x128xf32>
    %25 = arith.mulf %24, %24 : vector<112x128xf32>
    %cst_10 = arith.constant dense<0.000000e+00> : vector<112xf32>
    %26 = vector.multi_reduction <add>, %25, %cst_10 [1] : vector<112x128xf32> to vector<112xf32>
    %27 = vector.shape_cast %26 : vector<112xf32> to vector<112x1xf32>
    %cst_11 = arith.constant 1.280000e+02 : f32
    %28 = vector.broadcast %cst_11 : f32 to vector<112x1xf32>
    %29 = arith.divf %27, %28 : vector<112x1xf32>
    %cst_12 = arith.constant 9.99999997E-7 : f32
    %30 = vector.broadcast %cst_12 : f32 to vector<112x1xf32>
    %31 = arith.addf %29, %30 : vector<112x1xf32>
    %32 = math.rsqrt %31 : vector<112x1xf32>
    %33 = vector.broadcast %32 : vector<112x1xf32> to vector<112x128xf32>
    %34 = arith.mulf %24, %33 : vector<112x128xf32>
    %35 = vector.broadcast %5 : vector<1x128xf32> to vector<112x128xf32>
    %36 = arith.mulf %34, %35 : vector<112x128xf32>
    %37 = vector.broadcast %6 : vector<1x128xf32> to vector<112x128xf32>
    %38 = arith.addf %36, %37 : vector<112x128xf32>
    %39 = arith.truncf %38 : vector<112x128xf32> to vector<112x128xbf16>
    %c0_13 = arith.constant 0 : index
    %c0_14 = arith.constant 0 : index
    %40 = vector.load %arg3[%c0_13, %c0_14] : memref<128x128xbf16, #tpu.memory_space<vmem>>, vector<128x128xbf16>
    %cst_15 = arith.constant dense<0.000000e+00> : vector<112x128xf32>
    %41 = tpu.matmul %39, %40, %cst_15 {dimension_numbers = #tpu.dot_dimension_numbers<[1], [0], [0], [1], [0, 0, 1, 1], [], []>} : vector<112x128xbf16>, vector<128x128xbf16>, vector<112x128xf32> -> vector<112x128xf32>
    %42 = vector.broadcast %4 : vector<1x128xf32> to vector<112x128xf32>
    %43 = arith.addf %41, %42 : vector<112x128xf32>
    %c0_16 = arith.constant 0 : index
    %c0_17 = arith.constant 0 : index
    %44 = vector.load %arg5[%c0_16, %c0_17] : memref<112x128xf32, #tpu.memory_space<vmem>>, vector<112x128xf32>
    tpu.vector_store %arg5[%c0_16, %c0_17], %43 {strides = array<i32>} : memref<112x128xf32, #tpu.memory_space<vmem>>, vector<112x128xf32>,
    return
  }
  func.func @transform_0(%arg0: i32) -> (i32, i32) {
    %c0_i32 = arith.constant 0 : i32
    %c0_i32_0 = arith.constant 0 : i32
    return %arg0, %c0_i32 : i32, i32
  }
  func.func @transform_1(%arg0: i32) -> (i32, i32) {
    %c0_i32 = arith.constant 0 : i32
    %c0_i32_0 = arith.constant 0 : i32
    %c0_i32_1 = arith.constant 0 : i32
    return %c0_i32, %c0_i32_0 : i32, i32
  }
  func.func @transform_2(%arg0: i32) -> (i32, i32) {
    %c0_i32 = arith.constant 0 : i32
    %c0_i32_0 = arith.constant 0 : i32
    %c0_i32_1 = arith.constant 0 : i32
    return %c0_i32, %c0_i32_0 : i32, i32
  }
  func.func @transform_3(%arg0: i32) -> (i32, i32) {
    %c0_i32 = arith.constant 0 : i32
    %c0_i32_0 = arith.constant 0 : i32
    %c0_i32_1 = arith.constant 0 : i32
    return %c0_i32, %c0_i32_0 : i32, i32
  }
  func.func @transform_4(%arg0: i32) -> (i32, i32) {
    %c0_i32 = arith.constant 0 : i32
    %c0_i32_0 = arith.constant 0 : i32
    return %arg0, %c0_i32 : i32, i32
  }
}

</mosaic_0001>

<bundles_post_ra>
// kernel: _forward_impl.1
= control target key start
LH: loop header
LB: loop body
LE: loop exit
PB: predicated region body
PF: predicated region fallthrough
CT: control target
= control target key end

     0   :  { %v841_v0 = vmov 0.0   ;;  %vm842_vm0 = vmmov 0   ;;  %vm76_vm1 = vcmask 523264   ;;  %v48_v26 = vlaneseq  ;;  %s1235_s1 = inlined_call_operand.vmem [shape: bf16[64,128], index: 1, kind: input, shape index: {}]   ;;  %s1236_s0 = inlined_call_operand.vmem [shape: f32[112,64], index: 0, kind: input, shape index: {}]   ;;  %s1237_s3 = inlined_call_operand.vmem [shape: f32[4,128], index: 3, kind: input, shape index: {}]   ;;  %s1238_s2 = inlined_call_operand.vmem [shape: bf16[128,128], index: 2, kind: input, shape index: {}]   ;;  %s1239_s4 = inlined_call_operand.vmem [shape: f32[112,128], index: 4, kind: output, shape index: {}]  }
   0x1   :  { %675 = vmatprep.subr.bf16.mxu0 %v841_v0  ;;  %v773_v1 = vld [vmem:[%s1235_s1] sm:$0xff]   ;;  %683 = vmatprep.mubr.msk.bf16.mxu0 %vm842_vm0, %v841_v0  ;;  %v774_v2 = vld [vmem:[%s1235_s1 + $0x8] sm:$0xff]   ;;  %v775_v3 = vld [vmem:[%s1235_s1 + $0x10] sm:$0xff]  }
   0x2   :  { %755 = vmatprep.subr.bf16.mxu1 %v841_v0  ;;  %731 = vmatprep.mubr.msk.bf16.mxu1 %vm842_vm0, %v841_v0  ;;  %v776_v4 = vld [vmem:[%s1235_s1 + $0x18] sm:$0xff]   ;;  %v18_v5 = vld [vmem:[%s1236_s0] sm:$0xff]  ;;  %v19_v6 = vld [vmem:[%s1236_s0 + $0x8] sm:$0xff]  ;;  %v953_v27 = vshrl.u32 %v48_v26, 7 }
   0x3   :  { %676 = vmatpush3.bf16.msra.mxu0 %v773_v1  ;;  %v32_v7 = vpack.c.bf16 %v19_v6, %v18_v5  ;;  %v20_v8 = vld [vmem:[%s1236_s0 + $0x10] sm:$0xff]  ;;  %v21_v9 = vld [vmem:[%s1236_s0 + $0x18] sm:$0xff]  ;;  %v22_v11 = vld [vmem:[%s1236_s0 + $0x20] sm:$0xff] }
   0x4   :  { %677 = vmatprep.subr.bf16.mxu0 %v841_v0  ;;  %v33_v10 = vpack.c.bf16 %v21_v9, %v20_v8  ;;  %v23_v12 = vld [vmem:[%s1236_s0 + $0x28] sm:$0xff]  ;;  %v24_v14 = vld [vmem:[%s1236_s0 + $0x30] sm:$0xff]  ;;  %v25_v15 = vld [vmem:[%s1236_s0 + $0x38] sm:$0xff]  ;;  %v50_v31 = vsub.s32 0, %v953_v27 }
   0x5   :  { %v34_v13 = vpack.c.bf16 %v23_v12, %v22_v11  ;;  %v35_v16 = vpack.c.bf16 %v25_v15, %v24_v14  ;;  %v26_v17 = vld [vmem:[%s1236_s0 + $0x40] sm:$0xff]  ;;  %v27_v18 = vld [vmem:[%s1236_s0 + $0x48] sm:$0xff]  ;;  %v28_v20 = vld [vmem:[%s1236_s0 + $0x50] sm:$0xff] }
   0x6   :  { %v36_v19 = vpack.c.bf16 %v27_v18, %v26_v17  ;;  %v29_v21 = vld [vmem:[%s1236_s0 + $0x58] sm:$0xff]  ;;  %v30_v23 = vld [vmem:[%s1236_s0 + $0x60] sm:$0xff]  ;;  %v31_v24 = vld [vmem:[%s1236_s0 + $0x68] sm:$0xff] }
   0x7   :  { %678 = vmatpush3.bf16.msra.mxu0 %v774_v2  ;;  %v37_v22 = vpack.c.bf16 %v29_v21, %v28_v20  ;;  %v38_v25 = vpack.c.bf16 %v31_v24, %v30_v23  ;;  %v961_v33 = vld [vmem:[%s1237_s3] sm:$0xf] }
   0x8   :  { %679 = vmatprep.subr.bf16.mxu0 %v841_v0  ;;  %v964_v34 = vrot.slane %v961_v33, %v50_v31 }
   0xb   :  { %680 = vmatpush3.bf16.msra.mxu0 %v775_v3 }
   0xc   :  { %681 = vmatprep.subr.bf16.mxu0 %v841_v0 }
   0xf   :  { %682 = vmatpush3.bf16.msra.mxu0 %v776_v4 }
  0x10   :  { %711 = vmatprep.subr.bf16.mxu0 %v841_v0 }
  0x12   :  { %684 = vmatmul.mubr.msk.bf16.vlgmr.msra.gmra.mrb[0].mxu0 %vm76_vm1, %v32_v7 }
  0x13   :  { %687 = vmatprep.mubr.msk.bf16.mxu0 %vm842_vm0, %v841_v0 }
  0x1a   :  { %688 = vmatmul.mubr.msk.bf16.gmra.mrb[4].mxu0 %vm76_vm1, %v33_v10 }
  0x1b   :  { %691 = vmatprep.mubr.msk.bf16.mxu0 %vm842_vm0, %v841_v0 }
  0x22   :  { %692 = vmatmul.mubr.msk.bf16.gmra.mrb[8].mxu0 %vm76_vm1, %v34_v13 }
  0x23   :  { %695 = vmatprep.mubr.msk.bf16.mxu0 %vm842_vm0, %v841_v0 }
  0x2a   :  { %696 = vmatmul.mubr.msk.bf16.gmra.mrb[12].mxu0 %vm76_vm1, %v35_v16 }
  0x2b   :  { %699 = vmatprep.mubr.msk.bf16.mxu0 %vm842_vm0, %v841_v0 }
  0x32   :  { %700 = vmatmul.mubr.msk.bf16.gmra.mrb[16].mxu0 %vm76_vm1, %v36_v19 }
  0x33   :  { %703 = vmatprep.mubr.msk.bf16.mxu0 %vm842_vm0, %v841_v0 }
  0x3a   :  { %704 = vmatmul.mubr.msk.bf16.gmra.mrb[20].mxu0 %vm76_vm1, %v37_v22 }
  0x3b   :  { %707 = vmatprep.mubr.msk.bf16.mxu0 %vm842_vm0, %v841_v0 }
  0x42   :  { %708 = vmatmul.mubr.msk.bf16.gmra.mrb[24].mxu0 %vm76_vm1, %v38_v25 }
  0x43   :  { %727 = vmatprep.mubr.msk.bf16.mxu0 %vm842_vm0, %v841_v0 }
  0xe5   :  { %v132_v28 = vpop.f32.mrb[0].mxu0 }
  0xe6   :  { %v685_v29 = vpop.f32.mrb[1].mxu0  ;;  %v133_v17 = vadd.f32 %v132_v28, %v964_v34 }
  0xe7   :  { %v955_v30 = vpop.f32.mrb[2].mxu0 }
  0xe8   :  { %v686_v32 = vpop.f32.mrb[3].mxu0  ;;  %v136_v20 = vadd.f32 %v955_v30, %v964_v34  ;;  %v201_v23 = vmul.f32 0.70710677, %v133_v17 }
  0xea   :  { %v202_v32 = vmul.f32 0.70710677, %v136_v20 }
  0xed   :  { %v140_v35 = vpop.f32.mrb[4].mxu0 }
  0xee   :  { %v141_v36 = vadd.f32 %v140_v35, %v964_v34  ;;  %v689_v37 = vpop.f32.mrb[5].mxu0 }
  0xef   :  { %v143_v38 = vpop.f32.mrb[6].mxu0 }
  0xf0   :  { %v203_v39 = vmul.f32 0.70710677, %v141_v36  ;;  %v144_v40 = vadd.f32 %v143_v38, %v964_v34  ;;  %v690_v41 = vpop.f32.mrb[7].mxu0  ;;  %v189_v52 = vmul.f32 0.5, %v141_v36 }
  0xf2   :  { %785 = verf.f32 %v203_v39  ;;  %v204_v42 = vmul.f32 0.70710677, %v144_v40  ;;  %v190_v1 = vmul.f32 0.5, %v144_v40 }
  0xf4   :  { %787 = verf.f32 %v204_v42 }
  0xf5   :  { %v148_v43 = vpop.f32.mrb[8].mxu0 }
  0xf6   :  { %v149_v44 = vadd.f32 %v148_v43, %v964_v34  ;;  %v693_v45 = vpop.f32.mrb[9].mxu0 }
  0xf7   :  { %v151_v46 = vpop.f32.mrb[10].mxu0 }
  0xf8   :  { %v205_v47 = vmul.f32 0.70710677, %v149_v44  ;;  %v152_v48 = vadd.f32 %v151_v46, %v964_v34  ;;  %v694_v49 = vpop.f32.mrb[11].mxu0  ;;  %v191_v5 = vmul.f32 0.5, %v149_v44 }
  0xfa   :  { %789 = verf.f32 %v205_v47  ;;  %v206_v50 = vmul.f32 0.70710677, %v152_v48  ;;  %v192_v18 = vmul.f32 0.5, %v152_v48 }
  0xfc   :  { %v786_v51 = vpop.eup %785  ;;  %791 = verf.f32 %v206_v50 }
  0xfd   :  { %v156_v53 = vpop.f32.mrb[12].mxu0  ;;  %v231_v54 = vadd.f32 1.0, %v786_v51 }
  0xfe   :  { %v788_v55 = vpop.eup %787  ;;  %v157_v56 = vadd.f32 %v156_v53, %v964_v34  ;;  %v697_v57 = vpop.f32.mrb[13].mxu0 }
  0xff   :  { %v159_v58 = vpop.f32.mrb[14].mxu0  ;;  %v971_v59 = vmul.f32 %v231_v54, %v189_v52  ;;  %v232_v60 = vadd.f32 1.0, %v788_v55 }
 0x100   :  { %v207_v61 = vmul.f32 0.70710677, %v157_v56  ;;  %v160_v62 = vadd.f32 %v159_v58, %v964_v34  ;;  %v698_v63 = vpop.f32.mrb[15].mxu0  ;;  %v193_v24 = vmul.f32 0.5, %v157_v56 }
 0x101   :  { %261 = vadd.xlane.f32.xlu0 %v971_v59  ;;  %v975_v3 = vmul.f32 %v232_v60, %v190_v1 }
 0x102   :  { %793 = verf.f32 %v207_v61  ;;  %v208_v2 = vmul.f32 0.70710677, %v160_v62  ;;  %v194_v35 = vmul.f32 0.5, %v160_v62 }
 0x104   :  { %v790_v4 = vpop.eup %789  ;;  %795 = verf.f32 %v208_v2 }
 0x105   :  { %263 = vadd.xlane.f32.xlu0 %v975_v3  ;;  %v164_v6 = vpop.f32.mrb[16].mxu0  ;;  %v233_v7 = vadd.f32 1.0, %v790_v4 }
 0x106   :  { %v792_v8 = vpop.eup %791  ;;  %v165_v9 = vadd.f32 %v164_v6, %v964_v34  ;;  %v701_v10 = vpop.f32.mrb[17].mxu0 }
 0x107   :  { %v167_v11 = vpop.f32.mrb[18].mxu0  ;;  %v979_v12 = vmul.f32 %v233_v7, %v191_v5  ;;  %v234_v13 = vadd.f32 1.0, %v792_v8  ;;  %v187_v7 = vmul.f32 0.5, %v133_v17  ;;  %v188_v10 = vmul.f32 0.5, %v136_v20 }
 0x108   :  { %v209_v14 = vmul.f32 0.70710677, %v165_v9  ;;  %v168_v15 = vadd.f32 %v167_v11, %v964_v34  ;;  %v702_v16 = vpop.f32.mrb[19].mxu0  ;;  %v195_v44 = vmul.f32 0.5, %v165_v9 }
 0x109   :  { %265 = vadd.xlane.f32.xlu1 %v979_v12  ;;  %v986_v21 = vmul.f32 %v234_v13, %v192_v18 }
 0x10a   :  { %797 = verf.f32 %v209_v14  ;;  %v210_v19 = vmul.f32 0.70710677, %v168_v15  ;;  %v196_v50 = vmul.f32 0.5, %v168_v15 }
 0x10c   :  { %v794_v22 = vpop.eup %793  ;;  %799 = verf.f32 %v210_v19 }
 0x10d   :  { %267 = vadd.xlane.f32.xlu1 %v986_v21  ;;  %v172_v25 = vpop.f32.mrb[20].mxu0  ;;  %v235_v26 = vadd.f32 1.0, %v794_v22  ;;  %801 = verf.f32 %v201_v23  ;;  %v777_v23 = vld [vmem:[%s1238_s2] sm:$0xff]  }
 0x10e   :  { %v796_v29 = vpop.eup %795  ;;  %v173_v28 = vadd.f32 %v172_v25, %v964_v34  ;;  %v705_v31 = vpop.f32.mrb[21].mxu0  ;;  %763 = vmatpush3.bf16.msra.mxu1 %v777_v23  ;;  %712 = vmatpush3.bf16.msra.mxu0 %v777_v23 }
 0x10f   :  { %v175_v36 = vpop.f32.mrb[22].mxu0  ;;  %v990_v37 = vmul.f32 %v235_v26, %v193_v24  ;;  %v236_v30 = vadd.f32 1.0, %v796_v29  ;;  %756 = vmatprep.subr.bf16.mxu1 %v841_v0  ;;  %713 = vmatprep.subr.bf16.mxu0 %v841_v0 }
 0x110   :  { %v211_v38 = vmul.f32 0.70710677, %v173_v28  ;;  %v176_v39 = vadd.f32 %v175_v36, %v964_v34  ;;  %v706_v40 = vpop.f32.mrb[23].mxu0  ;;  %v197_v63 = vmul.f32 0.5, %v173_v28 }
 0x111   :  { %269 = vadd.xlane.f32.xlu0 %v990_v37  ;;  %v994_v41 = vmul.f32 %v236_v30, %v194_v35 }
 0x112   :  { %803 = verf.f32 %v211_v38  ;;  %v212_v42 = vmul.f32 0.70710677, %v176_v39  ;;  %v198_v4 = vmul.f32 0.5, %v176_v39 }
 0x113   :  { %805 = verf.f32 %v202_v32  ;;  %271 = vadd.xlane.f32.xlu1 %v994_v41 }
 0x114   :  { %v798_v43 = vpop.eup %797  ;;  %807 = verf.f32 %v212_v42 }
 0x115   :  { %v180_v45 = vpop.f32.mrb[24].mxu0  ;;  %v237_v46 = vadd.f32 1.0, %v798_v43 }
 0x116   :  { %v800_v47 = vpop.eup %799  ;;  %v181_v48 = vadd.f32 %v180_v45, %v964_v34  ;;  %v709_v49 = vpop.f32.mrb[25].mxu0 }
 0x117   :  { %v183_v51 = vpop.f32.mrb[26].mxu0  ;;  %v998_v52 = vmul.f32 %v237_v46, %v195_v44  ;;  %v238_v53 = vadd.f32 1.0, %v800_v47  ;;  %v802_v60 = vpop.eup %801  ;;  %v778_v47 = vld [vmem:[%s1238_s2 + $0x8] sm:$0xff]   ;;  %v779_v49 = vld [vmem:[%s1238_s2 + $0x10] sm:$0xff]  }
 0x118   :  { %v213_v54 = vmul.f32 0.70710677, %v181_v48  ;;  %v184_v55 = vadd.f32 %v183_v51, %v964_v34  ;;  %v710_v56 = vpop.f32.mrb[27].mxu0  ;;  %v229_v6 = vadd.f32 1.0, %v802_v60  ;;  %v199_v14 = vmul.f32 0.5, %v181_v48  ;;  %764 = vmatpush3.bf16.msra.mxu1 %v778_v47  ;;  %714 = vmatpush3.bf16.msra.mxu0 %v778_v47  ;;  %v781_v60 = vld [vmem:[%s1238_s2 + $0x20] sm:$0xff]  }
 0x119   :  { %273 = vadd.xlane.f32.xlu0 %v998_v52  ;;  %v1002_v57 = vmul.f32 %v238_v53, %v196_v50  ;;  %757 = vmatprep.subr.bf16.mxu1 %v841_v0 }
 0x11a   :  { %809 = verf.f32 %v213_v54  ;;  %v214_v58 = vmul.f32 0.70710677, %v184_v55  ;;  %v1011_v11 = vmul.f32 %v229_v6, %v187_v7  ;;  %v200_v19 = vmul.f32 0.5, %v184_v55  ;;  %715 = vmatprep.subr.bf16.mxu0 %v841_v0  ;;  %v780_v55 = vld [vmem:[%s1238_s2 + $0x18] sm:$0xff]  }
 0x11b   :  { %275 = vadd.xlane.f32.xlu1 %v1002_v57 }
 0x11c   :  { %v804_v61 = vpop.eup %803  ;;  %811 = verf.f32 %v214_v58  ;;  %765 = vmatpush3.bf16.msra.mxu1 %v779_v49  ;;  %716 = vmatpush3.bf16.msra.mxu0 %v779_v49  ;;  %v432_v49 = vsub.s32 3, %v953_v27 }
 0x11d   :  { %v806_v62 = vpop.eup %805  ;;  %v239_v1 = vadd.f32 1.0, %v804_v61  ;;  %758 = vmatprep.subr.bf16.mxu1 %v841_v0  ;;  %717 = vmatprep.subr.bf16.mxu0 %v841_v0 }
 0x11e   :  { %v808_v2 = vpop.eup %807  ;;  %v230_v9 = vadd.f32 1.0, %v806_v62 }
 0x11f   :  { %v1005_v5 = vmul.f32 %v239_v1, %v197_v63  ;;  %v240_v34 = vadd.f32 1.0, %v808_v2  ;;  %v782_v2 = vld [vmem:[%s1238_s2 + $0x28] sm:$0xff]  }
 0x120   :  { %v1014_v15 = vmul.f32 %v230_v9, %v188_v10  ;;  %766 = vmatpush3.bf16.msra.mxu1 %v780_v55  ;;  %718 = vmatpush3.bf16.msra.mxu0 %v780_v55 }
 0x121   :  { %277 = vadd.xlane.f32.xlu0 %v1005_v5  ;;  %v1008_v8 = vmul.f32 %v240_v34, %v198_v4  ;;  %759 = vmatprep.subr.bf16.mxu1 %v841_v0 }
 0x122   :  { %719 = vmatprep.subr.bf16.mxu0 %v841_v0 }
 0x123   :  { %279 = vadd.xlane.f32.xlu1 %v1008_v8 }
 0x124   :  { %v810_v13 = vpop.eup %809  ;;  %767 = vmatpush3.bf16.msra.mxu1 %v781_v60  ;;  %720 = vmatpush3.bf16.msra.mxu0 %v781_v60  ;;  %v1140_v60 = vrot.slane %v961_v33, %v432_v49 }
 0x125   :  { %257 = vadd.xlane.f32.xlu0 %v1011_v11  ;;  %v241_v16 = vadd.f32 1.0, %v810_v13  ;;  %760 = vmatprep.subr.bf16.mxu1 %v841_v0 }
 0x126   :  { %v812_v18 = vpop.eup %811  ;;  %721 = vmatprep.subr.bf16.mxu0 %v841_v0 }
 0x127   :  { %259 = vadd.xlane.f32.xlu1 %v1014_v15  ;;  %v1017_v17 = vmul.f32 %v241_v16, %v199_v14  ;;  %v242_v22 = vadd.f32 1.0, %v812_v18 }
 0x128   :  { %768 = vmatpush3.bf16.msra.mxu1 %v782_v2  ;;  %722 = vmatpush3.bf16.msra.mxu0 %v782_v2 }
 0x129   :  { %281 = vadd.xlane.f32.xlu0 %v1017_v17  ;;  %v1020_v20 = vmul.f32 %v242_v22, %v200_v19  ;;  %761 = vmatprep.subr.bf16.mxu1 %v841_v0 }
 0x12a   :  { %723 = vmatprep.subr.bf16.mxu0 %v841_v0 }
 0x12b   :  { %283 = vadd.xlane.f32.xlu1 %v1020_v20 }
 0x18e   :  { %v262_v24 = vpop.xlane.xlu0 %261 }
 0x18f   :  { %v288_v25 = vmul.f32 0.0078125, %v262_v24 }
 0x191   :  { %v1029_v26 = vsub.f32 %v971_v59, %v288_v25 }
 0x192   :  { %v264_v29 = vpop.xlane.xlu0 %263 }
 0x193   :  { %v289_v28 = vmul.f32 0.0078125, %v264_v29  ;;  %v316_v31 = vmul.f32 %v1029_v26, %v1029_v26 }
 0x195   :  { %v1034_v32 = vsub.f32 %v975_v3, %v289_v28  ;;  %332 = vadd.xlane.f32.xlu0 %v316_v31 }
 0x196   :  { %v266_v35 = vpop.xlane.xlu1 %265 }
 0x197   :  { %v290_v36 = vmul.f32 0.0078125, %v266_v35  ;;  %v317_v30 = vmul.f32 %v1034_v32, %v1034_v32 }
 0x199   :  { %v1039_v38 = vsub.f32 %v979_v12, %v290_v36  ;;  %334 = vadd.xlane.f32.xlu1 %v317_v30 }
 0x19a   :  { %v268_v59 = vpop.xlane.xlu1 %267 }
 0x19b   :  { %v291_v39 = vmul.f32 0.0078125, %v268_v59  ;;  %v318_v40 = vmul.f32 %v1039_v38, %v1039_v38 }
 0x19d   :  { %v1044_v42 = vsub.f32 %v986_v21, %v291_v39  ;;  %336 = vadd.xlane.f32.xlu0 %v318_v40 }
 0x19e   :  { %v270_v3 = vpop.xlane.xlu0 %269 }
 0x19f   :  { %v292_v43 = vmul.f32 0.0078125, %v270_v3  ;;  %v319_v44 = vmul.f32 %v1044_v42, %v1044_v42 }
 0x1a0   :  { %v272_v45 = vpop.xlane.xlu1 %271 }
 0x1a1   :  { %v1049_v46 = vsub.f32 %v990_v37, %v292_v43  ;;  %v293_v12 = vmul.f32 0.0078125, %v272_v45  ;;  %338 = vadd.xlane.f32.xlu1 %v319_v44  ;;  %v414_v43 = vsub.s32 2, %v953_v27 }
 0x1a3   :  { %v1055_v48 = vsub.f32 %v994_v41, %v293_v12  ;;  %v320_v21 = vmul.f32 %v1049_v46, %v1049_v46 }
 0x1a5   :  { %340 = vadd.xlane.f32.xlu0 %v320_v21  ;;  %v321_v37 = vmul.f32 %v1055_v48, %v1055_v48 }
 0x1a6   :  { %v274_v50 = vpop.xlane.xlu0 %273 }
 0x1a7   :  { %v294_v41 = vmul.f32 0.0078125, %v274_v50  ;;  %342 = vadd.xlane.f32.xlu1 %v321_v37  ;;  %v1134_v37 = vrot.slane %v961_v33, %v414_v43 }
 0x1a8   :  { %v276_v51 = vpop.xlane.xlu1 %275 }
 0x1a9   :  { %v1068_v53 = vsub.f32 %v998_v52, %v294_v41  ;;  %v295_v54 = vmul.f32 0.0078125, %v276_v51 }
 0x1ab   :  { %v1075_v56 = vsub.f32 %v1002_v57, %v295_v54  ;;  %v322_v58 = vmul.f32 %v1068_v53, %v1068_v53 }
 0x1ad   :  { %344 = vadd.xlane.f32.xlu0 %v322_v58  ;;  %v323_v52 = vmul.f32 %v1075_v56, %v1075_v56 }
 0x1ae   :  { %v278_v61 = vpop.xlane.xlu0 %277 }
 0x1af   :  { %v296_v57 = vmul.f32 0.0078125, %v278_v61  ;;  %346 = vadd.xlane.f32.xlu1 %v323_v52 }
 0x1b0   :  { %v280_v62 = vpop.xlane.xlu1 %279 }
 0x1b1   :  { %v1088_v63 = vsub.f32 %v1005_v5, %v296_v57  ;;  %v297_v1 = vmul.f32 0.0078125, %v280_v62 }
 0x1b2   :  { %v258_v4 = vpop.xlane.xlu0 %257 }
 0x1b3   :  { %v1095_v34 = vsub.f32 %v1008_v8, %v297_v1  ;;  %v286_v6 = vmul.f32 0.0078125, %v258_v4  ;;  %v324_v7 = vmul.f32 %v1088_v63, %v1088_v63  ;;  %v783_v8 = vld [vmem:[%s1238_s2 + $0x30] sm:$0xff]  }
 0x1b4   :  { %v260_v9 = vpop.xlane.xlu1 %259  ;;  %769 = vmatpush3.bf16.msra.mxu1 %v783_v8  ;;  %724 = vmatpush3.bf16.msra.mxu0 %v783_v8 }
 0x1b5   :  { %v1101_v5 = vsub.f32 %v1011_v11, %v286_v6  ;;  %v287_v10 = vmul.f32 0.0078125, %v260_v9  ;;  %348 = vadd.xlane.f32.xlu0 %v324_v7  ;;  %v325_v13 = vmul.f32 %v1095_v34, %v1095_v34  ;;  %762 = vmatprep.subr.bf16.mxu1 %v841_v0 }
 0x1b6   :  { %v282_v14 = vpop.xlane.xlu0 %281  ;;  %725 = vmatprep.subr.bf16.mxu0 %v841_v0 }
 0x1b7   :  { %v1110_v16 = vsub.f32 %v1014_v15, %v287_v10  ;;  %v298_v18 = vmul.f32 0.0078125, %v282_v14  ;;  %350 = vadd.xlane.f32.xlu1 %v325_v13  ;;  %v314_v11 = vmul.f32 %v1101_v5, %v1101_v5  ;;  %v784_v15 = vld [vmem:[%s1238_s2 + $0x38] sm:$0xff]  }
 0x1b8   :  { %v284_v19 = vpop.xlane.xlu1 %283  ;;  %770 = vmatpush3.bf16.msra.mxu1 %v784_v15  ;;  %726 = vmatpush3.bf16.msra.mxu0 %v784_v15 }
 0x1b9   :  { %v1116_v22 = vsub.f32 %v1017_v17, %v298_v18  ;;  %v299_v23 = vmul.f32 0.0078125, %v284_v19  ;;  %328 = vadd.xlane.f32.xlu0 %v314_v11  ;;  %v315_v24 = vmul.f32 %v1110_v16, %v1110_v16 }
 0x1bb   :  { %v1125_v25 = vsub.f32 %v1020_v20, %v299_v23  ;;  %330 = vadd.xlane.f32.xlu1 %v315_v24  ;;  %v326_v29 = vmul.f32 %v1116_v22, %v1116_v22 }
 0x1bd   :  { %352 = vadd.xlane.f32.xlu0 %v326_v29  ;;  %v327_v17 = vmul.f32 %v1125_v25, %v1125_v25 }
 0x1bf   :  { %354 = vadd.xlane.f32.xlu1 %v327_v17 }
 0x222   :  { %v333_v28 = vpop.xlane.xlu0 %332 }
 0x223   :  { %v358_v31 = vmul.f32 0.0078125, %v333_v28 }
 0x225   :  { %v372_v35 = vadd.f32 1e-06, %v358_v31 }
 0x226   :  { %v335_v36 = vpop.xlane.xlu1 %334 }
 0x227   :  { %813 = vrsqrt.f32 %v372_v35  ;;  %v359_v30 = vmul.f32 0.0078125, %v335_v36 }
 0x229   :  { %v373_v59 = vadd.f32 1e-06, %v359_v30 }
 0x22a   :  { %v337_v20 = vpop.xlane.xlu0 %336 }
 0x22b   :  { %815 = vrsqrt.f32 %v373_v59  ;;  %v360_v39 = vmul.f32 0.0078125, %v337_v20 }
 0x22d   :  { %v374_v40 = vadd.f32 1e-06, %v360_v39 }
 0x22e   :  { %v339_v3 = vpop.xlane.xlu1 %338 }
 0x22f   :  { %817 = vrsqrt.f32 %v374_v40  ;;  %v361_v44 = vmul.f32 0.0078125, %v339_v3 }
 0x231   :  { %v814_v45 = vpop.eup %813  ;;  %v375_v12 = vadd.f32 1e-06, %v361_v44 }
 0x232   :  { %v341_v47 = vpop.xlane.xlu0 %340  ;;  %v400_v21 = vmul.f32 %v814_v45, %v1029_v26 }
 0x233   :  { %819 = vrsqrt.f32 %v375_v12  ;;  %v362_v50 = vmul.f32 0.0078125, %v341_v47 }
 0x234   :  { %v343_v41 = vpop.xlane.xlu1 %342  ;;  %v418_v52 = vmul.f32 %v1134_v37, %v400_v21 }
 0x235   :  { %v816_v51 = vpop.eup %815  ;;  %v376_v54 = vadd.f32 1e-06, %v362_v50  ;;  %v363_v55 = vmul.f32 0.0078125, %v343_v41 }
 0x236   :  { %v401_v58 = vmul.f32 %v816_v51, %v1034_v32  ;;  %v436_v1 = vadd.f32 %v1140_v60, %v418_v52 }
 0x237   :  { %821 = vrsqrt.f32 %v376_v54  ;;  %v377_v26 = vadd.f32 1e-06, %v363_v55 }
 0x238   :  { %v419_v61 = vmul.f32 %v1134_v37, %v401_v58 }
 0x239   :  { %v818_v57 = vpop.eup %817  ;;  %823 = vrsqrt.f32 %v377_v26 }
 0x23a   :  { %v345_v62 = vpop.xlane.xlu0 %344  ;;  %v437_v2 = vadd.f32 %v1140_v60, %v419_v61  ;;  %v402_v4 = vmul.f32 %v818_v57, %v1039_v38 }
 0x23b   :  { %v364_v6 = vmul.f32 0.0078125, %v345_v62 }
 0x23c   :  { %v347_v32 = vpop.xlane.xlu1 %346  ;;  %v449_v7 = vpack.c.bf16 %v437_v2, %v436_v1  ;;  %v420_v14 = vmul.f32 %v1134_v37, %v402_v4 }
 0x23d   :  { %v820_v9 = vpop.eup %819  ;;  %v378_v10 = vadd.f32 1e-06, %v364_v6  ;;  %v365_v13 = vmul.f32 0.0078125, %v347_v32 }
 0x23e   :  { %732 = vmatmul.mubr.bf16.vlgmr.msra.gmra.mrb[0].mxu1 %v449_v7  ;;  %v403_v8 = vmul.f32 %v820_v9, %v1044_v42  ;;  %v438_v23 = vadd.f32 %v1140_v60, %v420_v14 }
 0x23f   :  { %825 = vrsqrt.f32 %v378_v10  ;;  %v379_v18 = vadd.f32 1e-06, %v365_v13  ;;  %735 = vmatprep.mubr.msk.bf16.mxu1 %vm842_vm0, %v841_v0 }
 0x240   :  { %v421_v11 = vmul.f32 %v1134_v37, %v403_v8 }
 0x241   :  { %v822_v19 = vpop.eup %821  ;;  %827 = vrsqrt.f32 %v379_v18 }
 0x242   :  { %v349_v38 = vpop.xlane.xlu0 %348  ;;  %v439_v24 = vadd.f32 %v1140_v60, %v421_v11  ;;  %v404_v15 = vmul.f32 %v822_v19, %v1049_v46 }
 0x243   :  { %v824_v29 = vpop.eup %823  ;;  %v366_v42 = vmul.f32 0.0078125, %v349_v38 }
 0x244   :  { %v351_v17 = vpop.xlane.xlu1 %350  ;;  %v450_v28 = vpack.c.bf16 %v439_v24, %v438_v23  ;;  %v405_v31 = vmul.f32 %v824_v29, %v1055_v48  ;;  %v422_v59 = vmul.f32 %v1134_v37, %v404_v15 }
 0x245   :  { %v380_v35 = vadd.f32 1e-06, %v366_v42  ;;  %v367_v36 = vmul.f32 0.0078125, %v351_v17 }
 0x246   :  { %v329_v30 = vpop.xlane.xlu0 %328  ;;  %736 = vmatmul.mubr.bf16.gmra.mrb[4].mxu1 %v450_v28  ;;  %v423_v20 = vmul.f32 %v1134_v37, %v405_v31  ;;  %v440_v12 = vadd.f32 %v1140_v60, %v422_v59  ;;  %v473_v28 = vsub.s32 1, %v953_v27 }
 0x247   :  { %829 = vrsqrt.f32 %v380_v35  ;;  %v381_v39 = vadd.f32 1e-06, %v367_v36  ;;  %v356_v40 = vmul.f32 0.0078125, %v329_v30  ;;  %739 = vmatprep.mubr.msk.bf16.mxu1 %vm842_vm0, %v841_v0 }
 0x248   :  { %v331_v46 = vpop.xlane.xlu1 %330  ;;  %v441_v3 = vadd.f32 %v1140_v60, %v423_v20 }
 0x249   :  { %v826_v43 = vpop.eup %825  ;;  %831 = vrsqrt.f32 %v381_v39  ;;  %v370_v48 = vadd.f32 1e-06, %v356_v40  ;;  %v357_v44 = vmul.f32 0.0078125, %v331_v46 }
 0x24a   :  { %v353_v45 = vpop.xlane.xlu0 %352  ;;  %v406_v47 = vmul.f32 %v826_v43, %v1068_v53  ;;  %v451_v51 = vpack.c.bf16 %v441_v3, %v440_v12 }
 0x24b   :  { %v828_v21 = vpop.eup %827  ;;  %833 = vrsqrt.f32 %v370_v48  ;;  %v371_v49 = vadd.f32 1e-06, %v357_v44  ;;  %v368_v50 = vmul.f32 0.0078125, %v353_v45 }
 0x24c   :  { %v355_v41 = vpop.xlane.xlu1 %354  ;;  %v407_v54 = vmul.f32 %v828_v21, %v1075_v56  ;;  %v424_v52 = vmul.f32 %v1134_v37, %v406_v47 }
 0x24d   :  { %835 = vrsqrt.f32 %v371_v49  ;;  %v382_v55 = vadd.f32 1e-06, %v368_v50  ;;  %v369_v58 = vmul.f32 0.0078125, %v355_v41 }
 0x24e   :  { %740 = vmatmul.mubr.bf16.gmra.mrb[8].mxu1 %v451_v51  ;;  %v425_v26 = vmul.f32 %v1134_v37, %v407_v54  ;;  %v442_v62 = vadd.f32 %v1140_v60, %v424_v52 }
 0x24f   :  { %837 = vrsqrt.f32 %v382_v55  ;;  %v383_v61 = vadd.f32 1e-06, %v369_v58  ;;  %743 = vmatprep.mubr.msk.bf16.mxu1 %vm842_vm0, %v841_v0 }
 0x250   :  { %v443_v53 = vadd.f32 %v1140_v60, %v425_v26 }
 0x251   :  { %v830_v57 = vpop.eup %829  ;;  %839 = vrsqrt.f32 %v383_v61 }
 0x252   :  { %v408_v56 = vmul.f32 %v830_v57, %v1088_v63  ;;  %v452_v2 = vpack.c.bf16 %v443_v53, %v442_v62 }
 0x253   :  { %v832_v1 = vpop.eup %831 }
 0x254   :  { %v409_v4 = vmul.f32 %v832_v1, %v1095_v34  ;;  %v426_v7 = vmul.f32 %v1134_v37, %v408_v56 }
 0x255   :  { %v834_v6 = vpop.eup %833 }
 0x256   :  { %v398_v32 = vmul.f32 %v834_v6, %v1101_v5  ;;  %744 = vmatmul.mubr.bf16.gmra.mrb[12].mxu1 %v452_v2  ;;  %v427_v9 = vmul.f32 %v1134_v37, %v409_v4  ;;  %v444_v5 = vadd.f32 %v1140_v60, %v426_v7 }
 0x257   :  { %v836_v10 = vpop.eup %835  ;;  %747 = vmatprep.mubr.msk.bf16.mxu1 %vm842_vm0, %v841_v0 }
 0x258   :  { %v416_v13 = vmul.f32 %v1134_v37, %v398_v32  ;;  %v399_v63 = vmul.f32 %v836_v10, %v1110_v16  ;;  %v445_v8 = vadd.f32 %v1140_v60, %v427_v9 }
 0x259   :  { %v838_v14 = vpop.eup %837 }
 0x25a   :  { %v417_v34 = vmul.f32 %v1134_v37, %v399_v63  ;;  %v410_v18 = vmul.f32 %v838_v14, %v1116_v22  ;;  %v453_v19 = vpack.c.bf16 %v445_v8, %v444_v5  ;;  %v434_v38 = vadd.f32 %v1140_v60, %v416_v13 }
 0x25b   :  { %v840_v11 = vpop.eup %839 }
 0x25c   :  { %v435_v23 = vadd.f32 %v1140_v60, %v417_v34  ;;  %v411_v24 = vmul.f32 %v840_v11, %v1125_v25  ;;  %v428_v16 = vmul.f32 %v1134_v37, %v410_v18  ;;  %v474_v25 = vrot.slane %v961_v33, %v473_v28 }
 0x25e   :  { %748 = vmatmul.mubr.bf16.gmra.mrb[16].mxu1 %v453_v19  ;;  %v448_v15 = vpack.c.bf16 %v435_v23, %v434_v38  ;;  %v429_v29 = vmul.f32 %v1134_v37, %v411_v24  ;;  %v446_v42 = vadd.f32 %v1140_v60, %v428_v16 }
 0x25f   :  { %751 = vmatprep.mubr.msk.bf16.mxu1 %vm842_vm0, %v841_v0 }
 0x260   :  { %728 = vmatmul.mubr.bf16.vlgmr.msra.gmra.mrb[28].mxu0 %v448_v15  ;;  %v447_v22 = vadd.f32 %v1140_v60, %v429_v29 }
 0x262   :  { %v454_v17 = vpack.c.bf16 %v447_v22, %v446_v42 }
 0x266   :  { %752 = vmatmul.mubr.bf16.gmra.mrb[20].mxu1 %v454_v17 }
 0x311   :  { %v565_v31 = vpop.f32.mrb[0].mxu1 }
 0x312   :  { %v566_v35 = vadd.f32 %v565_v31, %v474_v25  ;;  %v733_v36 = vpop.f32.mrb[1].mxu1 }
 0x313   :  { %v568_v30 = vpop.f32.mrb[2].mxu1 }
 0x314   :  { %614 = vst [vmem:[%s1239_s4 + $0x10] sm:$0xff] %v566_v35  ;;  %v569_v0 = vadd.f32 %v568_v30, %v474_v25  ;;  %v734_v37 = vpop.f32.mrb[3].mxu1 }
 0x316   :  { %615 = vst [vmem:[%s1239_s4 + $0x18] sm:$0xff] %v569_v0 }
 0x319   :  { %v573_v60 = vpop.f32.mrb[4].mxu1 }
 0x31a   :  { %v574_v59 = vadd.f32 %v573_v60, %v474_v25  ;;  %v737_v20 = vpop.f32.mrb[5].mxu1 }
 0x31b   :  { %v576_v27 = vpop.f32.mrb[6].mxu1 }
 0x31c   :  { %616 = vst [vmem:[%s1239_s4 + $0x20] sm:$0xff] %v574_v59  ;;  %v577_v33 = vadd.f32 %v576_v27, %v474_v25  ;;  %v738_v39 = vpop.f32.mrb[7].mxu1 }
 0x31e   :  { %617 = vst [vmem:[%s1239_s4 + $0x28] sm:$0xff] %v577_v33 }
 0x321   :  { %v581_v40 = vpop.f32.mrb[8].mxu1 }
 0x322   :  { %v582_v46 = vadd.f32 %v581_v40, %v474_v25  ;;  %v741_v3 = vpop.f32.mrb[9].mxu1 }
 0x323   :  { %v584_v43 = vpop.f32.mrb[10].mxu1 }
 0x324   :  { %618 = vst [vmem:[%s1239_s4 + $0x30] sm:$0xff] %v582_v46  ;;  %v585_v48 = vadd.f32 %v584_v43, %v474_v25  ;;  %v742_v44 = vpop.f32.mrb[11].mxu1 }
 0x326   :  { %619 = vst [vmem:[%s1239_s4 + $0x38] sm:$0xff] %v585_v48 }
 0x329   :  { %v589_v45 = vpop.f32.mrb[12].mxu1 }
 0x32a   :  { %v590_v12 = vadd.f32 %v589_v45, %v474_v25  ;;  %v745_v47 = vpop.f32.mrb[13].mxu1 }
 0x32b   :  { %v592_v21 = vpop.f32.mrb[14].mxu1 }
 0x32c   :  { %620 = vst [vmem:[%s1239_s4 + $0x40] sm:$0xff] %v590_v12  ;;  %v593_v49 = vadd.f32 %v592_v21, %v474_v25  ;;  %v746_v50 = vpop.f32.mrb[15].mxu1 }
 0x32e   :  { %621 = vst [vmem:[%s1239_s4 + $0x48] sm:$0xff] %v593_v49 }
 0x331   :  { %v597_v41 = vpop.f32.mrb[16].mxu1 }
 0x332   :  { %v598_v51 = vadd.f32 %v597_v41, %v474_v25  ;;  %v749_v54 = vpop.f32.mrb[17].mxu1 }
 0x333   :  { %v557_v55 = vpop.f32.mrb[28].mxu0  ;;  %v600_v58 = vpop.f32.mrb[18].mxu1 }
 0x334   :  { %622 = vst [vmem:[%s1239_s4 + $0x50] sm:$0xff] %v598_v51  ;;  %v558_v52 = vadd.f32 %v557_v55, %v474_v25  ;;  %v601_v26 = vadd.f32 %v600_v58, %v474_v25  ;;  %v729_v61 = vpop.f32.mrb[29].mxu0  ;;  %v750_v53 = vpop.f32.mrb[19].mxu1 }
 0x335   :  { %v560_v57 = vpop.f32.mrb[30].mxu0 }
 0x336   :  { %612 = vst [vmem:[%s1239_s4] sm:$0xff] %v558_v52  ;;  %623 = vst [vmem:[%s1239_s4 + $0x58] sm:$0xff] %v601_v26  ;;  %v561_v62 = vadd.f32 %v560_v57, %v474_v25  ;;  %v730_v56 = vpop.f32.mrb[31].mxu0 }
 0x338   :  { %613 = vst [vmem:[%s1239_s4 + $0x8] sm:$0xff] %v561_v62 }
 0x339   :  { %v605_v1 = vpop.f32.mrb[20].mxu1 }
 0x33a   :  { %v606_v2 = vadd.f32 %v605_v1, %v474_v25  ;;  %v753_v4 = vpop.f32.mrb[21].mxu1 }
 0x33b   :  { %v608_v6 = vpop.f32.mrb[22].mxu1 }
 0x33c   :  { %624 = vst [vmem:[%s1239_s4 + $0x60] sm:$0xff] %v606_v2  ;;  %v609_v32 = vadd.f32 %v608_v6, %v474_v25  ;;  %v754_v7 = vpop.f32.mrb[23].mxu1 }
 0x33e   :  { %625 = vst [vmem:[%s1239_s4 + $0x68] sm:$0xff] %v609_v32 }

</bundles_post_ra>
